<compile_context>
chip_gen: v5e
topology: v5e:2x2
jax: 0.10.0
libtpu: 0.0.40
codegen_flags: <defaults>
</compile_context>

<pallas_src>
import functools

import jax
import jax.numpy as jnp
from jax.experimental import pallas as pl


F_PAD = 128    # conv feature lanes (zero-padded -> lane-dense activations)
NC_PAD = 128   # class lanes (zero-padded -> lane-dense head matmul / output)
KKC_PAD = 128  # im2col contraction depth (zero-padded -> full-depth MXU push)


# ----------------------------- Pallas kernel ------------------------------

def _fused_cnn_kernel(im2col_ref, wconv_ref, bconv_ref, wdense_ref, bdense_ref,
                      o_ref, *, B, HW, NC):
    """Fused conv3x3('same') + bias + ReLU -> global-avg-pool -> dense -> softmax.

    im2col_ref: (M, KKC_PAD)      bf16 lane-dense im2col patches, M = B*H*W
    wconv_ref:  (KKC_PAD, F_PAD)  bf16 conv weights (zero-padded both ways)
    bconv_ref:  (1, F_PAD)        f32 conv bias (zero-padded)
    wdense_ref: (F_PAD, NC_PAD)   f32 dense weights, 1/(H*W) pre-folded
    bdense_ref: (1, NC_PAD)       f32 dense bias (zero-padded)
    o_ref:      (B, NC_PAD)       f32 softmax probabilities (lane-dense)
    """
    # Conv as ONE full-depth MXU pass: (M,128) bf16 @ (128,128) bf16 -> f32.
    act = jnp.dot(im2col_ref[...], wconv_ref[...],
                  preferred_element_type=jnp.float32)          # (M, F_PAD)

    # Bias + ReLU in f32 (padded feature lanes stay exactly 0).
    act = jnp.maximum(act + bconv_ref[...], 0.0)

    # Global SUM pool over H*W (the 1/(H*W) scale lives in wdense), in VMEM.
    pooled = jnp.sum(act.reshape(B, HW, act.shape[-1]), axis=1)  # (B, F_PAD)

    # Tiny dense head kept in f32 (negligible cost; keeps parity tight and
    # avoids bf16 on the non-MXU-dominated path).
    logits = jnp.dot(pooled, wdense_ref[...],
                     preferred_element_type=jnp.float32) + bdense_ref[...]

    # Mask padded class lanes, then exact numerically-stable softmax.
    lane = jax.lax.broadcasted_iota(jnp.int32, logits.shape, 1)
    logits = jnp.where(lane < NC, logits, jnp.float32(-1e30))
    m = jnp.max(logits, axis=-1, keepdims=True)
    e = jnp.exp(logits - m)
    s = jnp.sum(e, axis=-1, keepdims=True)

    # Lane-dense full-width store; the wrapper slices out the real classes.
    o_ref[...] = e / s


def _fused_forward(im2col, wconv, bconv, wdense, bdense, *, B, HW, NC):
    kernel = functools.partial(_fused_cnn_kernel, B=B, HW=HW, NC=NC)
    # Grid-less call: every operand is a single whole-array VMEM block
    # (default specs) -> no per-step pipeline overhead at these tiny shapes.
    return pl.pallas_call(
        kernel,
        out_shape=jax.ShapeDtypeStruct((B, NC_PAD), jnp.float32),
    )(im2col, wconv, bconv, wdense, bdense)


# ------------------------------ model wrapper -----------------------------

class KerasModelWrapperPallas:
    """Synthetic stand-in for KerasModelWrapper: a tiny CNN classifier."""

    def __init__(self, in_channels=4, conv_features=8, num_classes=10,
                 kernel_size=3, input_hw=(16, 16), key=jax.random.PRNGKey(42)):
        assert conv_features <= F_PAD and num_classes <= NC_PAD
        assert kernel_size * kernel_size * in_channels <= KKC_PAD
        k1, k2, k3, k4 = jax.random.split(key, 4)
        self.k = kernel_size
        self.in_channels = in_channels
        self.conv_features = conv_features
        self.num_classes = num_classes
        self.input_hw = tuple(input_hw)

        # Un-padded f32 weights (also used by the pure-JAX reference).
        self.conv_w = jax.random.normal(
            k1, (kernel_size, kernel_size, in_channels, conv_features),
            dtype=jnp.float32) * 0.1
        self.conv_b = jax.random.normal(
            k2, (1, conv_features), dtype=jnp.float32) * 0.1
        self.dense_w = jax.random.normal(
            k3, (conv_features, num_classes), dtype=jnp.float32) * 0.1
        self.dense_b = jax.random.normal(
            k4, (1, num_classes), dtype=jnp.float32) * 0.1

        # Kernel-side padded, lane-dense layouts (built once at init).
        kk = kernel_size * kernel_size
        kkc = kk * in_channels
        # Conv weights flattened tap-major then channel (matches the im2col
        # column ordering), zero-padded to a full 128-deep contraction, bf16.
        wconv_flat = self.conv_w.reshape(kk, in_channels, conv_features)
        wconv_flat = wconv_flat.reshape(kkc, conv_features)
        self.wconv_p = jnp.pad(
            wconv_flat,
            ((0, KKC_PAD - kkc), (0, F_PAD - conv_features))
        ).astype(jnp.bfloat16)
        self.bconv_p = jnp.pad(
            self.conv_b, ((0, 0), (0, F_PAD - conv_features)))
        # Fold the 1/(H*W) global-average-pool scale into the dense weights
        # (pool in-kernel becomes a plain sum).
        inv_hw = 1.0 / float(self.input_hw[0] * self.input_hw[1])
        self.wdense_p = jnp.pad(
            self.dense_w * inv_hw,
            ((0, F_PAD - conv_features), (0, NC_PAD - num_classes)))
        self.bdense_p = jnp.pad(
            self.dense_b, ((0, 0), (0, NC_PAD - num_classes)))

        self._jit_forward = jax.jit(self._forward_impl)

    def _forward_impl(self, x_nchw):
        # PyTorch NCHW -> NHWC, spatial zero-pad, lane-dense im2col repack.
        # (im2col in XLA for these tiny shapes, per perf review: the kernel
        # then only touches lane-dense 128-wide slabs.)
        x = jnp.transpose(x_nchw, (0, 2, 3, 1)).astype(jnp.float32)
        B, H, W, C = x.shape
        assert C == self.in_channels
        assert (H, W) == self.input_hw  # pool scale folded into wdense at init
        pad = self.k // 2
        xp = jnp.pad(x, ((0, 0), (pad, pad), (pad, pad), (0, 0)))
        taps = [xp[:, dh:dh + H, dw:dw + W, :]
                for dh in range(self.k) for dw in range(self.k)]
        patches = jnp.stack(taps, axis=3)                    # (B, H, W, KK, C)
        kkc = self.k * self.k * C
        im2col = patches.reshape(B * H * W, kkc)             # (M, KKC)
        im2col = jnp.pad(
            im2col, ((0, 0), (0, KKC_PAD - kkc))).astype(jnp.bfloat16)

        probs_pad = _fused_forward(
            im2col, self.wconv_p, self.bconv_p, self.wdense_p, self.bdense_p,
            B=B, HW=H * W, NC=self.num_classes)
        # Only now slice down to the real classes (kernel output stays
        # lane-dense / full-width).
        return probs_pad[:, :self.num_classes]

    def forward(self, x_nchw):
        return self._jit_forward(x_nchw)

    __call__ = forward

    # Pure-JAX reference (no Pallas, all f32) for correctness checking.
    def reference_forward(self, x_nchw):
        x = jnp.transpose(x_nchw, (0, 2, 3, 1)).astype(jnp.float32)
        y = jax.lax.conv_general_dilated(
            x, self.conv_w, window_strides=(1, 1), padding="SAME",
            dimension_numbers=("NHWC", "HWIO", "NHWC"))
        y = jnp.maximum(y + self.conv_b.reshape(1, 1, 1, -1), 0.0)
        pooled = jnp.mean(y, axis=(1, 2))
        logits = pooled @ self.dense_w + self.dense_b
        return jax.nn.softmax(logits, axis=-1)


# ---------------------------------- main -----------------------------------

if __name__ == "__main__":
    key = jax.random.PRNGKey(0)
    B, C, H, W = 2, 4, 16, 16
    x = jax.random.normal(key, (B, C, H, W), dtype=jnp.float32)

    model = KerasModelWrapperPallas(in_channels=C, conv_features=8,
                                    num_classes=10, input_hw=(H, W))
    out = jax.block_until_ready(model(x))

    assert out.shape == (B, 10)
    assert out.dtype == jnp.float32
    # Exact softmax divide -> rows sum to 1 tightly.
    assert bool(jnp.all(jnp.abs(jnp.sum(out, axis=-1) - 1.0) < 1e-3))
    # Numerical check against the pure-JAX f32 reference (bf16 MXU operands
    # on the conv matmul -> small, well-within-tolerance differences).
    ref = jax.block_until_ready(model.reference_forward(x))
    assert bool(jnp.allclose(out, ref, atol=5e-3, rtol=5e-3))
    print("KERNEL_OK")
</pallas_src>

<mosaic_0001>
module attributes {stable_mosaic.version = 11 : i64} {
  func.func @_fused_cnn_kernel(%arg0: memref<512x128xbf16, #tpu.memory_space<vmem>>, %arg1: memref<128x128xbf16, #tpu.memory_space<vmem>>, %arg2: memref<1x128xf32, #tpu.memory_space<vmem>>, %arg3: memref<128x128xf32, #tpu.memory_space<vmem>>, %arg4: memref<1x128xf32, #tpu.memory_space<vmem>>, %arg5: memref<2x128xf32, #tpu.memory_space<vmem>>) attributes {dimension_semantics = [], scalar_prefetch = 0 : i64, scratch_operands = 0 : i64, tpu.core_type = #tpu.core_type<tc>} {
    %c0 = arith.constant 0 : index
    %c0_0 = arith.constant 0 : index
    %0 = vector.load %arg0[%c0, %c0_0] : memref<512x128xbf16, #tpu.memory_space<vmem>>, vector<512x128xbf16>
    %c0_1 = arith.constant 0 : index
    %c0_2 = arith.constant 0 : index
    %1 = vector.load %arg1[%c0_1, %c0_2] : memref<128x128xbf16, #tpu.memory_space<vmem>>, vector<128x128xbf16>
    %cst = arith.constant dense<0.000000e+00> : vector<512x128xf32>
    %2 = tpu.matmul %0, %1, %cst {dimension_numbers = #tpu.dot_dimension_numbers<[1], [0], [0], [1], [0, 0, 1, 1], [], []>} : vector<512x128xbf16>, vector<128x128xbf16>, vector<512x128xf32> -> vector<512x128xf32>
    %c0_3 = arith.constant 0 : index
    %c0_4 = arith.constant 0 : index
    %3 = vector.load %arg2[%c0_3, %c0_4] : memref<1x128xf32, #tpu.memory_space<vmem>>, vector<1x128xf32>
    %4 = vector.broadcast %3 : vector<1x128xf32> to vector<512x128xf32>
    %5 = arith.addf %2, %4 : vector<512x128xf32>
    %cst_5 = arith.constant 0.000000e+00 : f32
    %6 = vector.broadcast %cst_5 : f32 to vector<512x128xf32>
    %7 = arith.maximumf %5, %6 : vector<512x128xf32>
    %8 = vector.shape_cast %7 : vector<512x128xf32> to vector<2x256x128xf32>
    %cst_6 = arith.constant dense<0.000000e+00> : vector<2x128xf32>
    %9 = vector.multi_reduction <add>, %8, %cst_6 [1] : vector<2x256x128xf32> to vector<2x128xf32>
    %c0_7 = arith.constant 0 : index
    %c0_8 = arith.constant 0 : index
    %10 = vector.load %arg3[%c0_7, %c0_8] : memref<128x128xf32, #tpu.memory_space<vmem>>, vector<128x128xf32>
    %cst_9 = arith.constant dense<0.000000e+00> : vector<2x128xf32>
    %11 = tpu.matmul %9, %10, %cst_9 {dimension_numbers = #tpu.dot_dimension_numbers<[1], [0], [0], [1], [0, 0, 1, 1], [], []>} : vector<2x128xf32>, vector<128x128xf32>, vector<2x128xf32> -> vector<2x128xf32>
    %c0_10 = arith.constant 0 : index
    %c0_11 = arith.constant 0 : index
    %12 = vector.load %arg4[%c0_10, %c0_11] : memref<1x128xf32, #tpu.memory_space<vmem>>, vector<1x128xf32>
    %13 = vector.broadcast %12 : vector<1x128xf32> to vector<2x128xf32>
    %14 = arith.addf %11, %13 : vector<2x128xf32>
    %15 = tpu.iota {dimensions = array<i32: 1>} : vector<2x128xi32>
    %c10_i32 = arith.constant 10 : i32
    %16 = vector.broadcast %c10_i32 : i32 to vector<2x128xi32>
    %17 = arith.cmpi slt, %15, %16 : vector<2x128xi32>
    %cst_12 = arith.constant -1.000000e+30 : f32
    %18 = vector.broadcast %cst_12 : f32 to vector<2x128xf32>
    %19 = arith.select %17, %14, %18 : vector<2x128xi1>, vector<2x128xf32>
    %cst_13 = arith.constant dense<0xFF800000> : vector<2xf32>
    %20 = vector.multi_reduction <maximumf>, %19, %cst_13 [1] : vector<2x128xf32> to vector<2xf32>
    %21 = vector.shape_cast %20 : vector<2xf32> to vector<2x1xf32>
    %22 = vector.broadcast %21 : vector<2x1xf32> to vector<2x128xf32>
    %23 = arith.subf %19, %22 : vector<2x128xf32>
    %24 = math.exp %23 : vector<2x128xf32>
    %cst_14 = arith.constant dense<0.000000e+00> : vector<2xf32>
    %25 = vector.multi_reduction <add>, %24, %cst_14 [1] : vector<2x128xf32> to vector<2xf32>
    %26 = vector.shape_cast %25 : vector<2xf32> to vector<2x1xf32>
    %27 = vector.broadcast %26 : vector<2x1xf32> to vector<2x128xf32>
    %28 = arith.divf %24, %27 : vector<2x128xf32>
    %c0_15 = arith.constant 0 : index
    %c0_16 = arith.constant 0 : index
    %29 = vector.load %arg5[%c0_15, %c0_16] : memref<2x128xf32, #tpu.memory_space<vmem>>, vector<2x128xf32>
    tpu.vector_store %arg5[%c0_15, %c0_16], %28 {strides = array<i32>} : memref<2x128xf32, #tpu.memory_space<vmem>>, vector<2x128xf32>,
    return
  }
}

</mosaic_0001>

<bundles_post_ra>
// kernel: _forward_impl.1
= control target key start
LH: loop header
LB: loop body
LE: loop exit
PB: predicated region body
PF: predicated region fallthrough
CT: control target
= control target key end

     0   :  { %s1382_s0 = inlined_call_operand.vmem [shape: bf16[512,128], index: 0, kind: input, shape index: {}]   ;;  %s1383_s1 = inlined_call_operand.vmem [shape: bf16[128,128], index: 1, kind: input, shape index: {}]   ;;  %s1384_s2 = inlined_call_operand.vmem [shape: f32[1,128], index: 2, kind: input, shape index: {}]   ;;  %s1385_s3 = inlined_call_operand.vmem [shape: f32[128,128], index: 3, kind: input, shape index: {}]   ;;  %s1386_s4 = inlined_call_operand.vmem [shape: f32[1,128], index: 4, kind: input, shape index: {}]   ;;  %s1387_s5 = inlined_call_operand.hbm [shape: f32[2,128], index: 5, kind: output, shape index: {}]  }
   0x1   :  { %v942_v0 = vld [vmem:[%s1383_s1 + $0x38] sm:$0xff]  ;;  %v941_v1 = vld [vmem:[%s1383_s1 + $0x30] sm:$0xff] }
   0x2   :  { %345 = vmatpush.bf16.msra.mxu0 %v942_v0  ;;  %944 = vmatpush.bf16.msra.mxu2 %v942_v0 }
   0x3   :  { %945 = vmatpush.bf16.msra.mxu3 %v942_v0  ;;  %943 = vmatpush.bf16.msra.mxu1 %v942_v0 }
   0x4   :  { %10 = vsyncpa [#allocation3], 0  ;;  %v940_v2 = vld [vmem:[%s1383_s1 + $0x28] sm:$0xff]  ;;  %v939_v3 = vld [vmem:[%s1383_s1 + $0x20] sm:$0xff]  ;;  %vm674_vm0 = vcmask 1041409   ;;  %vm701_vm2 = vcmask 1041408  }
   0x5   :  { %v938_v4 = vld [vmem:[%s1383_s1 + $0x18] sm:$0xff]  ;;  %v937_v5 = vld [vmem:[%s1383_s1 + $0x10] sm:$0xff]  ;;  %v936_v6 = vld [vmem:[%s1383_s1 + $0x8] sm:$0xff]  ;;  %s734_s28 = sshll.u32 %s1387_s5, 4  ;;  %s735_s28 = int_to_ptr.hbm [resolvable:$true] %s734_s28 }
   0x6   :  { %346 = vmatpush.bf16.msra.mxu0 %v941_v1  ;;  %947 = vmatpush.bf16.msra.mxu2 %v941_v1  ;;  %v935_v7 = vld [vmem:[%s1383_s1] sm:$0xff]  ;;  %v917_v9 = vld [vmem:[%s1382_s0 + $0x70] sm:$0xff]  ;;  %v926_v10 = vld [vmem:[%s1382_s0 + $0xb8] sm:$0xff] }
   0x7   :  { %948 = vmatpush.bf16.msra.mxu3 %v941_v1  ;;  %946 = vmatpush.bf16.msra.mxu1 %v941_v1  ;;  %v903_v8 = vld [vmem:[%s1382_s0] sm:$0xff]  ;;  %v904_v11 = vld [vmem:[%s1382_s0 + $0x8] sm:$0xff]  ;;  %v918_v12 = vld [vmem:[%s1382_s0 + $0x78] sm:$0xff] }
   0x8   :  { %v927_v13 = vld [vmem:[%s1382_s0 + $0xc0] sm:$0xff]  ;;  %v905_v15 = vld [vmem:[%s1382_s0 + $0x10] sm:$0xff]  ;;  %v928_v17 = vld [vmem:[%s1382_s0 + $0xc8] sm:$0xff] }
   0x9   :  { %v911_v14 = vld [vmem:[%s1382_s0 + $0x40] sm:$0xff]  ;;  %v912_v18 = vld [vmem:[%s1382_s0 + $0x48] sm:$0xff]  ;;  %v906_v19 = vld [vmem:[%s1382_s0 + $0x18] sm:$0xff] }
   0xa   :  { %347 = vmatpush.bf16.msra.mxu0 %v940_v2  ;;  %950 = vmatpush.bf16.msra.mxu2 %v940_v2  ;;  %v919_v16 = vld [vmem:[%s1382_s0 + $0x80] sm:$0xff]  ;;  %v920_v20 = vld [vmem:[%s1382_s0 + $0x88] sm:$0xff]  ;;  %v929_v21 = vld [vmem:[%s1382_s0 + $0xd0] sm:$0xff] }
   0xb   :  { %951 = vmatpush.bf16.msra.mxu3 %v940_v2  ;;  %949 = vmatpush.bf16.msra.mxu1 %v940_v2  ;;  %v913_v22 = vld [vmem:[%s1382_s0 + $0x50] sm:$0xff]  ;;  %v907_v23 = vld [vmem:[%s1382_s0 + $0x20] sm:$0xff]  ;;  %v930_v25 = vld [vmem:[%s1382_s0 + $0xd8] sm:$0xff] }
   0xc   :  { %v921_v24 = vld [vmem:[%s1382_s0 + $0x90] sm:$0xff]  ;;  %v914_v26 = vld [vmem:[%s1382_s0 + $0x58] sm:$0xff]  ;;  %v908_v27 = vld [vmem:[%s1382_s0 + $0x28] sm:$0xff] }
   0xd   :  { %v922_v28 = vld [vmem:[%s1382_s0 + $0x98] sm:$0xff]  ;;  %v931_v29 = vld [vmem:[%s1382_s0 + $0xe0] sm:$0xff]  ;;  %v909_v31 = vld [vmem:[%s1382_s0 + $0x30] sm:$0xff] }
   0xe   :  { %348 = vmatpush.bf16.msra.mxu0 %v939_v3  ;;  %953 = vmatpush.bf16.msra.mxu2 %v939_v3  ;;  %v915_v30 = vld [vmem:[%s1382_s0 + $0x60] sm:$0xff]  ;;  %v932_v33 = vld [vmem:[%s1382_s0 + $0xe8] sm:$0xff]  ;;  %v910_v35 = vld [vmem:[%s1382_s0 + $0x38] sm:$0xff] }
   0xf   :  { %954 = vmatpush.bf16.msra.mxu3 %v939_v3  ;;  %952 = vmatpush.bf16.msra.mxu1 %v939_v3  ;;  %v923_v32 = vld [vmem:[%s1382_s0 + $0xa0] sm:$0xff]  ;;  %v916_v34 = vld [vmem:[%s1382_s0 + $0x68] sm:$0xff]  ;;  %v933_v37 = vld [vmem:[%s1382_s0 + $0xf0] sm:$0xff] }
  0x10   :  { %v924_v36 = vld [vmem:[%s1382_s0 + $0xa8] sm:$0xff]  ;;  %v925_v38 = vld [vmem:[%s1382_s0 + $0xb0] sm:$0xff]  ;;  %v934_v40 = vld [vmem:[%s1382_s0 + $0xf8] sm:$0xff] }
  0x11   :  { %v1154_v41 = vld [vmem:[%s1384_s2] ss:$0 sm:$0xff] }
  0x12   :  { %349 = vmatpush.bf16.msra.mxu0 %v938_v4  ;;  %956 = vmatpush.bf16.msra.mxu2 %v938_v4 }
  0x13   :  { %957 = vmatpush.bf16.msra.mxu3 %v938_v4  ;;  %955 = vmatpush.bf16.msra.mxu1 %v938_v4 }
  0x16   :  { %350 = vmatpush.bf16.msra.mxu0 %v937_v5  ;;  %959 = vmatpush.bf16.msra.mxu2 %v937_v5 }
  0x17   :  { %960 = vmatpush.bf16.msra.mxu3 %v937_v5  ;;  %958 = vmatpush.bf16.msra.mxu1 %v937_v5 }
  0x1a   :  { %351 = vmatpush.bf16.msra.mxu0 %v936_v6  ;;  %962 = vmatpush.bf16.msra.mxu2 %v936_v6 }
  0x1b   :  { %963 = vmatpush.bf16.msra.mxu3 %v936_v6  ;;  %961 = vmatpush.bf16.msra.mxu1 %v936_v6 }
  0x1e   :  { %352 = vmatpush.bf16.msra.mxu0 %v935_v7  ;;  %965 = vmatpush.bf16.msra.mxu2 %v935_v7 }
  0x1f   :  { %966 = vmatpush.bf16.msra.mxu3 %v935_v7  ;;  %964 = vmatpush.bf16.msra.mxu1 %v935_v7 }
  0x21   :  { %353 = vmatmul.bf16.vlgmr.msra.gmra.mxu0 %v903_v8  ;;  %423 = vmatmul.bf16.vlgmr.msra.gmra.mxu2 %v917_v9 }
  0x22   :  { %468 = vmatmul.bf16.vlgmr.msra.gmra.mxu3 %v926_v10  ;;  %393 = vmatmul.bf16.vlgmr.msra.gmra.mxu1 %v911_v14 }
  0x31   :  { %358 = vmatmul.bf16.gmra.mxu0 %v904_v11  ;;  %428 = vmatmul.bf16.gmra.mxu2 %v918_v12 }
  0x32   :  { %473 = vmatmul.bf16.gmra.mxu3 %v927_v13  ;;  %398 = vmatmul.bf16.gmra.mxu1 %v912_v18 }
  0x41   :  { %363 = vmatmul.bf16.gmra.mxu0 %v905_v15  ;;  %433 = vmatmul.bf16.gmra.mxu2 %v919_v16 }
  0x42   :  { %478 = vmatmul.bf16.gmra.mxu3 %v928_v17  ;;  %403 = vmatmul.bf16.gmra.mxu1 %v913_v22 }
  0x51   :  { %368 = vmatmul.bf16.gmra.mxu0 %v906_v19  ;;  %438 = vmatmul.bf16.gmra.mxu2 %v920_v20 }
  0x52   :  { %483 = vmatmul.bf16.gmra.mxu3 %v929_v21  ;;  %408 = vmatmul.bf16.gmra.mxu1 %v914_v26 }
  0x61   :  { %373 = vmatmul.bf16.gmra.mxu0 %v907_v23  ;;  %443 = vmatmul.bf16.gmra.mxu2 %v921_v24 }
  0x62   :  { %488 = vmatmul.bf16.gmra.mxu3 %v930_v25  ;;  %413 = vmatmul.bf16.gmra.mxu1 %v915_v30 }
  0x71   :  { %378 = vmatmul.bf16.gmra.mxu0 %v908_v27  ;;  %448 = vmatmul.bf16.gmra.mxu2 %v922_v28 }
  0x72   :  { %493 = vmatmul.bf16.gmra.mxu3 %v931_v29  ;;  %418 = vmatmul.bf16.gmra.mxu1 %v916_v34 }
  0x81   :  { %383 = vmatmul.bf16.gmra.mxu0 %v909_v31  ;;  %453 = vmatmul.bf16.gmra.mxu2 %v923_v32  ;;  %v667_v31 = vld [vmem:[%s1385_s3 + $0x78] sm:$0xff]  ;;  %v666_v32 = vld [vmem:[%s1385_s3 + $0x70] sm:$0xff] }
  0x82   :  { %498 = vmatmul.bf16.gmra.mxu3 %v932_v33  ;;  %677 = vmatpush.msrb.mxu1 %v667_v31  ;;  %v662_v31 = vld [vmem:[%s1385_s3 + $0x50] sm:$0xff] }
  0x84   :  { %678 = vmatpush.msrb.mxu1 %v666_v32 }
  0x91   :  { %388 = vmatmul.bf16.gmra.mxu0 %v910_v35  ;;  %458 = vmatmul.bf16.gmra.mxu2 %v924_v36 }
  0x92   :  { %503 = vmatmul.bf16.gmra.mxu3 %v933_v37  ;;  %v665_v37 = vld [vmem:[%s1385_s3 + $0x68] sm:$0xff] }
  0x93   :  { %679 = vmatpush.msrb.mxu1 %v665_v37 }
  0x9e   :  { %v354_v39 = vpop.f32.mrf.mxu0 }
  0x9f   :  { %v355_v42 = vadd.f32 %v1154_v41, %v354_v39  ;;  %v1172_v61 = vpop.f32.mrf.mxu1 }
  0xa1   :  { %463 = vmatmul.bf16.gmra.mxu2 %v925_v38  ;;  %v514_v46 = vmax.f32 %v355_v42, 0.0 }
  0xa2   :  { %508 = vmatmul.bf16.gmra.mxu3 %v934_v40 }
  0xa4   :  { %v1157_v43 = vpop.f32.mrf.mxu2 }
  0xa5   :  { %v1159_v44 = vpop.f32.mrf.mxu3 }
  0xa6   :  { %v356_v45 = vpop.f32.mrf.mxu0 }
  0xa7   :  { %v357_v47 = vadd.f32 %v1154_v41, %v356_v45  ;;  %v1179_v6 = vpop.f32.mrf.mxu1 }
  0xa9   :  { %v515_v48 = vmax.f32 %v357_v47, 0.0 }
  0xab   :  { %v578_v49 = vadd.f32 %v515_v48, %v514_v46 }
  0xac   :  { %v1162_v50 = vpop.f32.mrf.mxu2 }
  0xad   :  { %v1164_v51 = vpop.f32.mrf.mxu3 }
  0xae   :  { %v359_v52 = vpop.f32.mrf.mxu0 }
  0xaf   :  { %v360_v53 = vadd.f32 %v1154_v41, %v359_v52  ;;  %v1185_v13 = vpop.f32.mrf.mxu1 }
  0xb1   :  { %v516_v54 = vmax.f32 %v360_v53, 0.0 }
  0xb3   :  { %v579_v55 = vadd.f32 %v578_v49, %v516_v54 }
  0xb4   :  { %v1167_v56 = vpop.f32.mrf.mxu2 }
  0xb5   :  { %v1169_v58 = vpop.f32.mrf.mxu3 }
  0xb6   :  { %v361_v57 = vpop.f32.mrf.mxu0 }
  0xb7   :  { %v362_v59 = vadd.f32 %v1154_v41, %v361_v57  ;;  %v1190_v22 = vpop.f32.mrf.mxu1 }
  0xb9   :  { %v517_v60 = vmax.f32 %v362_v59, 0.0 }
  0xbb   :  { %v580_v62 = vadd.f32 %v579_v55, %v517_v60 }
  0xbc   :  { %v1174_v63 = vpop.f32.mrf.mxu2 }
  0xbd   :  { %v1177_v2 = vpop.f32.mrf.mxu3 }
  0xbe   :  { %v364_v0 = vpop.f32.mrf.mxu0 }
  0xbf   :  { %v365_v1 = vadd.f32 %v1154_v41, %v364_v0  ;;  %v1198_v27 = vpop.f32.mrf.mxu1 }
  0xc1   :  { %v518_v3 = vmax.f32 %v365_v1, 0.0 }
  0xc3   :  { %v581_v4 = vadd.f32 %v580_v62, %v518_v3 }
  0xc4   :  { %v434_v5 = vpop.f32.mrf.mxu2 }
  0xc5   :  { %v1181_v8 = vpop.f32.mrf.mxu3  ;;  %v435_v9 = vadd.f32 %v1154_v41, %v434_v5 }
  0xc6   :  { %v366_v7 = vpop.f32.mrf.mxu0 }
  0xc7   :  { %v546_v14 = vmax.f32 %v435_v9, 0.0  ;;  %v1212_v34 = vpop.f32.mrf.mxu1  ;;  %v367_v47 = vadd.f32 %v1154_v41, %v366_v7 }
  0xc9   :  { %v519_v52 = vmax.f32 %v367_v47, 0.0 }
  0xcb   :  { %v582_v62 = vadd.f32 %v581_v4, %v519_v52  ;;  %v664_v4 = vld [vmem:[%s1385_s3 + $0x60] sm:$0xff] }
  0xcc   :  { %v436_v10 = vpop.f32.mrf.mxu2  ;;  %680 = vmatpush.msrb.mxu1 %v664_v4 }
  0xcd   :  { %v437_v11 = vadd.f32 %v1154_v41, %v436_v10  ;;  %v1187_v18 = vpop.f32.mrf.mxu3 }
  0xce   :  { %v369_v12 = vpop.f32.mrf.mxu0 }
  0xcf   :  { %v547_v15 = vmax.f32 %v437_v11, 0.0  ;;  %v1221_v40 = vpop.f32.mrf.mxu1  ;;  %v370_v49 = vadd.f32 %v1154_v41, %v369_v12 }
  0xd1   :  { %v615_v16 = vadd.f32 %v547_v15, %v546_v14  ;;  %v520_v55 = vmax.f32 %v370_v49, 0.0 }
  0xd3   :  { %v583_v3 = vadd.f32 %v582_v62, %v520_v55 }
  0xd4   :  { %v439_v17 = vpop.f32.mrf.mxu2 }
  0xd5   :  { %v440_v19 = vadd.f32 %v1154_v41, %v439_v17  ;;  %v1196_v26 = vpop.f32.mrf.mxu3 }
  0xd6   :  { %v371_v20 = vpop.f32.mrf.mxu0 }
  0xd7   :  { %v548_v21 = vmax.f32 %v440_v19, 0.0  ;;  %v1228_v48 = vpop.f32.mrf.mxu1  ;;  %v372_v53 = vadd.f32 %v1154_v41, %v371_v20  ;;  %v663_v19 = vld [vmem:[%s1385_s3 + $0x58] sm:$0xff] }
  0xd8   :  { %681 = vmatpush.msrb.mxu1 %v663_v19 }
  0xd9   :  { %v1192_v23 = vadd.f32 %v615_v16, %v548_v21  ;;  %v521_v0 = vmax.f32 %v372_v53, 0.0 }
  0xda   :  { %682 = vmatpush.msrb.mxu1 %v662_v31  ;;  %v405_v31 = vadd.f32 %v1154_v41, %v1198_v27 }
  0xdb   :  { %v584_v10 = vadd.f32 %v583_v3, %v521_v0  ;;  %v395_v0 = vadd.f32 %v1154_v41, %v1172_v61 }
  0xdc   :  { %v1194_v24 = vpop.f32.mrf.mxu2 }
  0xdd   :  { %v1202_v30 = vpop.f32.mrf.mxu3  ;;  %v442_v55 = vadd.f32 %v1154_v41, %v1194_v24  ;;  %v530_v61 = vmax.f32 %v395_v0, 0.0 }
  0xde   :  { %v374_v25 = vpop.f32.mrf.mxu0 }
  0xdf   :  { %v375_v57 = vadd.f32 %v1154_v41, %v374_v25  ;;  %v1239_v9 = vpop.f32.mrf.mxu1 }
  0xe1   :  { %v522_v5 = vmax.f32 %v375_v57, 0.0 }
  0xe3   :  { %v585_v15 = vadd.f32 %v584_v10, %v522_v5  ;;  %v549_v10 = vmax.f32 %v442_v55, 0.0 }
  0xe4   :  { %v1200_v28 = vpop.f32.mrf.mxu2 }
  0xe5   :  { %v1214_v36 = vpop.f32.mrf.mxu3 }
  0xe6   :  { %v376_v29 = vpop.f32.mrf.mxu0 }
  0xe7   :  { %v377_v1 = vadd.f32 %v1154_v41, %v376_v29  ;;  %v416_v53 = vpop.f32.mrf.mxu1 }
  0xe9   :  { %v523_v11 = vmax.f32 %v377_v1, 0.0  ;;  %v445_v1 = vadd.f32 %v1154_v41, %v1200_v28 }
  0xeb   :  { %v586_v21 = vadd.f32 %v585_v15, %v523_v11  ;;  %v400_v15 = vadd.f32 %v1154_v41, %v1185_v13 }
  0xec   :  { %v1210_v33 = vpop.f32.mrf.mxu2 }
  0xed   :  { %v1225_v45 = vpop.f32.mrf.mxu3  ;;  %v447_v11 = vadd.f32 %v1154_v41, %v1210_v33  ;;  %v617_v33 = vadd.f32 %v1192_v23, %v549_v10 }
  0xee   :  { %v379_v35 = vpop.f32.mrf.mxu0 }
  0xef   :  { %v380_v7 = vadd.f32 %v1154_v41, %v379_v35 }
  0xf1   :  { %v524_v16 = vmax.f32 %v380_v7, 0.0  ;;  %v397_v7 = vadd.f32 %v1154_v41, %v1179_v6  ;;  %v402_v6 = vadd.f32 %v1154_v41, %v1190_v22  ;;  %v660_v22 = vld [vmem:[%s1385_s3 + $0x40] sm:$0xff] }
  0xf3   :  { %v587_v35 = vadd.f32 %v586_v21, %v524_v16  ;;  %v531_v19 = vmax.f32 %v397_v7, 0.0  ;;  %v551_v21 = vmax.f32 %v447_v11, 0.0  ;;  %v533_v23 = vmax.f32 %v402_v6, 0.0 }
  0xf4   :  { %v1219_v38 = vpop.f32.mrf.mxu2 }
  0xf5   :  { %v1235_v60 = vpop.f32.mrf.mxu3  ;;  %v450_v28 = vadd.f32 %v1154_v41, %v1219_v38 }
  0xf6   :  { %v381_v39 = vpop.f32.mrf.mxu0 }
  0xf7   :  { %v382_v12 = vadd.f32 %v1154_v41, %v381_v39  ;;  %v552_v38 = vmax.f32 %v450_v28, 0.0 }
  0xf9   :  { %v525_v25 = vmax.f32 %v382_v12, 0.0 }
  0xfb   :  { %v588_v47 = vadd.f32 %v587_v35, %v525_v25  ;;  %v419_v35 = vpop.f32.mrf.mxu1 }
  0xfc   :  { %v1223_v42 = vpop.f32.mrf.mxu2 }
  0xfd   :  { %v1255_v32 = vpop.f32.mrf.mxu3  ;;  %v452_v25 = vadd.f32 %v1154_v41, %v1223_v42  ;;  %v407_v42 = vadd.f32 %v1154_v41, %v1212_v34  ;;  %v412_v34 = vadd.f32 %v1154_v41, %v1228_v48 }
  0xfe   :  { %v384_v46 = vpop.f32.mrf.mxu0 }
  0xff   :  { %v385_v17 = vadd.f32 %v1154_v41, %v384_v46  ;;  %v661_v46 = vld [vmem:[%s1385_s3 + $0x48] sm:$0xff]  ;;  %v537_v48 = vmax.f32 %v412_v34, 0.0 }
 0x100   :  { %683 = vmatpush.msrb.mxu1 %v661_v46 }
 0x101   :  { %v526_v37 = vmax.f32 %v385_v17, 0.0  ;;  %v550_v17 = vmax.f32 %v445_v1, 0.0 }
 0x102   :  { %684 = vmatpush.msrb.mxu1 %v660_v22 }
 0x103   :  { %v589_v57 = vadd.f32 %v588_v47, %v526_v37  ;;  %v618_v37 = vadd.f32 %v617_v33, %v550_v17 }
 0x104   :  { %v1232_v54 = vpop.f32.mrf.mxu2 }
 0x105   :  { %v1274_v16 = vpop.f32.mrf.mxu3  ;;  %v619_v47 = vadd.f32 %v618_v37, %v551_v21  ;;  %v420_v21 = vadd.f32 %v1154_v41, %v419_v35  ;;  %v472_v35 = vadd.f32 %v1154_v41, %v1164_v51 }
 0x106   :  { %v386_v59 = vpop.f32.mrf.mxu0 }
 0x107   :  { %v387_v29 = vadd.f32 %v1154_v41, %v386_v59 }
 0x109   :  { %v527_v49 = vmax.f32 %v387_v29, 0.0  ;;  %v532_v29 = vmax.f32 %v400_v15, 0.0  ;;  %v417_v15 = vadd.f32 %v1154_v41, %v416_v53  ;;  %v470_v53 = vadd.f32 %v1154_v41, %v1159_v44  ;;  %v659_v44 = vld [vmem:[%s1385_s3 + $0x38] sm:$0xff] }
 0x10a   :  { %685 = vmatpush.msrb.mxu1 %v659_v44 }
 0x10b   :  { %v590_v3 = vadd.f32 %v589_v57, %v527_v49  ;;  %v553_v49 = vmax.f32 %v452_v25, 0.0  ;;  %v534_v57 = vmax.f32 %v405_v31, 0.0  ;;  %v539_v25 = vmax.f32 %v417_v15, 0.0 }
 0x10c   :  { %v1242_v14 = vpop.f32.mrf.mxu2 }
 0x10d   :  { %v457_v27 = vadd.f32 %v1154_v41, %v1242_v14  ;;  %v1301_v10 = vpop.f32.mrf.mxu3 }
 0x10e   :  { %v389_v20 = vpop.f32.mrf.mxu0 }
 0x10f   :  { %v390_v39 = vadd.f32 %v1154_v41, %v389_v20  ;;  %v555_v11 = vmax.f32 %v457_v27, 0.0 }
 0x111   :  { %v528_v59 = vmax.f32 %v390_v39, 0.0  ;;  %v455_v39 = vadd.f32 %v1154_v41, %v1232_v54  ;;  %v410_v54 = vadd.f32 %v1154_v41, %v1221_v40 }
 0x113   :  { %v591_v24 = vadd.f32 %v590_v3, %v528_v59  ;;  %v620_v59 = vadd.f32 %v619_v47, %v552_v38  ;;  %v535_v3 = vmax.f32 %v407_v42, 0.0 }
 0x114   :  { %v459_v52 = vpop.f32.mrf.mxu2 }
 0x115   :  { %v460_v0 = vadd.f32 %v1154_v41, %v459_v52  ;;  %v621_v14 = vadd.f32 %v620_v59, %v553_v49  ;;  %v1315_v42 = vpop.f32.mrf.mxu3 }
 0x116   :  { %v391_v62 = vpop.f32.mrf.mxu0 }
 0x117   :  { %v392_v5 = vadd.f32 %v1154_v41, %v391_v62  ;;  %v554_v62 = vmax.f32 %v455_v39, 0.0 }
 0x119   :  { %v529_v12 = vmax.f32 %v392_v5, 0.0  ;;  %v415_v5 = vadd.f32 %v1154_v41, %v1239_v9  ;;  %v622_v52 = vadd.f32 %v621_v14, %v554_v62  ;;  %v658_v62 = vld [vmem:[%s1385_s3 + $0x30] sm:$0xff] }
 0x11a   :  { %686 = vmatpush.msrb.mxu1 %v658_v62 }
 0x11b   :  { %v592_v4 = vadd.f32 %v591_v24, %v529_v12  ;;  %v536_v12 = vmax.f32 %v410_v54, 0.0  ;;  %v623_v9 = vadd.f32 %v622_v52, %v555_v11  ;;  %v560_v54 = vmax.f32 %v470_v53, 0.0 }
 0x11c   :  { %v461_v20 = vpop.f32.mrf.mxu2  ;;  %v432_v11 = vadd.f32 %v1154_v41, %v1174_v63  ;;  %v482_v52 = vadd.f32 %v1154_v41, %v1187_v18  ;;  %v485_v63 = vadd.f32 %v1154_v41, %v1196_v26  ;;  %v655_v18 = vld [vmem:[%s1385_s3 + $0x18] sm:$0xff]  ;;  %v654_v26 = vld [vmem:[%s1385_s3 + $0x10] sm:$0xff] }
 0x11d   :  { %v593_v13 = vadd.f32 %v592_v4, %v530_v61  ;;  %v462_v40 = vadd.f32 %v1154_v41, %v461_v20  ;;  %v556_v61 = vmax.f32 %v460_v0, 0.0  ;;  %v538_v4 = vmax.f32 %v415_v5, 0.0 }
 0x11f   :  { %v594_v46 = vadd.f32 %v593_v13, %v531_v19  ;;  %v421_v19 = vpop.f32.mrf.mxu1  ;;  %v557_v33 = vmax.f32 %v462_v40, 0.0  ;;  %v624_v13 = vadd.f32 %v623_v9, %v556_v61 }
 0x120   :  { %v422_v31 = vadd.f32 %v1154_v41, %v421_v19 }
 0x121   :  { %v595_v55 = vadd.f32 %v594_v46, %v532_v29  ;;  %v625_v39 = vadd.f32 %v624_v13, %v557_v33  ;;  %v540_v46 = vmax.f32 %v420_v21, 0.0  ;;  %v490_v13 = vadd.f32 %v1154_v41, %v1214_v36  ;;  %v652_v36 = vld [vmem:[%s1385_s3] sm:$0xff] }
 0x123   :  { %v596_v1 = vadd.f32 %v595_v55, %v533_v23  ;;  %v425_v23 = vadd.f32 %v1154_v41, %v1157_v43  ;;  %v541_v55 = vmax.f32 %v422_v31, 0.0  ;;  %v475_v43 = vadd.f32 %v1154_v41, %v1169_v58  ;;  %v657_v58 = vld [vmem:[%s1385_s3 + $0x28] sm:$0xff] }
 0x124   :  { %v464_v7 = vpop.f32.mrf.mxu2  ;;  %687 = vmatpush.msrb.mxu1 %v657_v58  ;;  %v492_v31 = vadd.f32 %v1154_v41, %v1225_v45 }
 0x125   :  { %v597_v24 = vadd.f32 %v596_v1, %v534_v57  ;;  %v465_v28 = vadd.f32 %v1154_v41, %v464_v7  ;;  %v427_v57 = vadd.f32 %v1154_v41, %v1162_v50  ;;  %v542_v0 = vmax.f32 %v425_v23, 0.0  ;;  %v656_v7 = vld [vmem:[%s1385_s3 + $0x20] sm:$0xff] }
 0x126   :  { %v430_v1 = vadd.f32 %v1154_v41, %v1167_v56  ;;  %v477_v50 = vadd.f32 %v1154_v41, %v1177_v2  ;;  %v562_v56 = vmax.f32 %v475_v43, 0.0  ;;  %688 = vmatpush.msrb.mxu1 %v656_v7  ;;  %v497_v23 = vadd.f32 %v1154_v41, %v1255_v32 }
 0x127   :  { %v598_v17 = vadd.f32 %v597_v24, %v535_v3  ;;  %v558_v20 = vmax.f32 %v465_v28, 0.0  ;;  %v561_v3 = vmax.f32 %v472_v35, 0.0  ;;  %v543_v14 = vmax.f32 %v427_v57, 0.0 }
 0x128   :  { %v480_v24 = vadd.f32 %v1154_v41, %v1181_v8  ;;  %v563_v15 = vmax.f32 %v477_v50, 0.0  ;;  %v545_v28 = vmax.f32 %v432_v11, 0.0  ;;  %v487_v8 = vadd.f32 %v1154_v41, %v1202_v30  ;;  %689 = vmatpush.msrb.mxu1 %v655_v18  ;;  %v653_v30 = vld [vmem:[%s1385_s3 + $0x8] sm:$0xff] }
 0x129   :  { %v599_v6 = vadd.f32 %v598_v17, %v536_v12  ;;  %v626_v49 = vadd.f32 %v625_v39, %v558_v20  ;;  %v544_v12 = vmax.f32 %v430_v1, 0.0  ;;  %v505_v57 = vadd.f32 %v1154_v41, %v1315_v42 }
 0x12a   :  { %v567_v20 = vmax.f32 %v487_v8, 0.0  ;;  %690 = vmatpush.msrb.mxu1 %v654_v26 }
 0x12b   :  { %v600_v29 = vadd.f32 %v599_v6, %v537_v48  ;;  %v506_v48 = vpop.f32.mrf.mxu3  ;;  %v565_v6 = vmax.f32 %v482_v52, 0.0  ;;  %v574_v62 = vmax.f32 %v505_v57, 0.0 }
 0x12c   :  { %v466_v37 = vpop.f32.mrf.mxu2  ;;  %691 = vmatpush.msrb.mxu1 %v653_v30  ;;  %v507_v32 = vadd.f32 %v1154_v41, %v506_v48 }
 0x12d   :  { %v601_v38 = vadd.f32 %v600_v29, %v538_v4  ;;  %v467_v22 = vadd.f32 %v1154_v41, %v466_v37  ;;  %v564_v4 = vmax.f32 %v480_v24, 0.0  ;;  %v568_v37 = vmax.f32 %v490_v13, 0.0 }
 0x12e   :  { %692 = vmatpush.msrb.mxu1 %v652_v36  ;;  %v575_v50 = vmax.f32 %v507_v32, 0.0 }
 0x12f   :  { %v602_v47 = vadd.f32 %v601_v38, %v539_v25  ;;  %v559_v27 = vmax.f32 %v467_v22, 0.0  ;;  %v566_v25 = vmax.f32 %v485_v63, 0.0  ;;  %v495_v38 = vadd.f32 %v1154_v41, %v1235_v60 }
 0x130   :  { %v569_v22 = vmax.f32 %v492_v31, 0.0 }
 0x131   :  { %v603_v59 = vadd.f32 %v602_v47, %v540_v46  ;;  %v627_v51 = vadd.f32 %v626_v49, %v559_v27  ;;  %v570_v45 = vmax.f32 %v495_v38, 0.0  ;;  %v500_v47 = vadd.f32 %v1154_v41, %v1274_v16 }
 0x132   :  { %v571_v27 = vmax.f32 %v497_v23, 0.0 }
 0x133   :  { %v628_v34 = vadd.f32 %v627_v51, %v560_v54  ;;  %v604_v5 = vadd.f32 %v603_v59, %v541_v55  ;;  %v509_v46 = vpop.f32.mrf.mxu3  ;;  %v502_v55 = vadd.f32 %v1154_v41, %v1301_v10  ;;  %v572_v60 = vmax.f32 %v500_v47, 0.0 }
 0x134   :  { %v510_v16 = vadd.f32 %v1154_v41, %v509_v46 }
 0x135   :  { %v629_v2 = vadd.f32 %v628_v34, %v561_v3  ;;  %v605_v40 = vadd.f32 %v604_v5, %v542_v0  ;;  %v573_v43 = vmax.f32 %v502_v55, 0.0 }
 0x136   :  { %v576_v5 = vmax.f32 %v510_v16, 0.0 }
 0x137   :  { %v630_v61 = vadd.f32 %v629_v2, %v562_v56  ;;  %v606_v17 = vadd.f32 %v605_v40, %v543_v14 }
 0x139   :  { %v631_v19 = vadd.f32 %v630_v61, %v563_v15  ;;  %v607_v9 = vadd.f32 %v606_v17, %v544_v12 }
 0x13b   :  { %v632_v33 = vadd.f32 %v631_v19, %v564_v4  ;;  %v608_v21 = vadd.f32 %v607_v9, %v545_v28  ;;  %v511_v51 = vpop.f32.mrf.mxu3  ;;  %v969_v4 = vld [vmem:[%s1386_s4] ss:$0 sm:$0xff]  ;;  %s1000_s4 = smov [#allocation2]  }
 0x13c   :  { %v512_v10 = vadd.f32 %v1154_v41, %v511_v51  ;;  %v697_v41 = vlaneseq  ;;  %s732_s25 = sshll.u32 %s1000_s4, 4  ;;  %s733_s25 = int_to_ptr.vmem [resolvable:$true] %s732_s25 }
 0x13d   :  { %v633_v29 = vadd.f32 %v632_v33, %v565_v6  ;;  %v609_v1 = vrot.slane %v608_v21, 4 }
 0x13e   :  { %v577_v42 = vmax.f32 %v512_v10, 0.0  ;;  %v698_v48 = vand.u32 127, %v697_v41 }
 0x13f   :  { %v634_v53 = vadd.f32 %v633_v29, %v566_v25  ;;  %v610_v58 = vadd.f32 %v609_v1, %v608_v21 }
 0x140   :  { %vm699_vm1 = vcmp.lt.s32.totalorder %v698_v48, 10 }
 0x141   :  { %v635_v39 = vadd.f32 %v634_v53, %v567_v20  ;;  %v611_v11 = vrot.slane %v610_v58, 2 }
 0x143   :  { %v636_v35 = vadd.f32 %v635_v39, %v568_v37  ;;  %v612_v2 = vadd.f32 %v611_v11, %v610_v58 }
 0x145   :  { %v637_v49 = vadd.f32 %v636_v35, %v569_v22  ;;  %v613_v15 = vrot.slane %v612_v2, 1 }
 0x147   :  { %v638_v44 = vadd.f32 %v637_v49, %v570_v45  ;;  %v614_v61 = vadd.f32 %v613_v15, %v612_v2 }
 0x149   :  { %v639_v54 = vadd.f32 %v638_v44, %v571_v27 }
 0x14b   :  { %v640_v59 = vadd.f32 %v639_v54, %v572_v60 }
 0x14d   :  { %v641_v0 = vadd.f32 %v640_v59, %v573_v43 }
 0x14f   :  { %v642_v3 = vadd.f32 %v641_v0, %v574_v62 }
 0x151   :  { %v643_v34 = vadd.f32 %v642_v3, %v575_v50 }
 0x153   :  { %v644_v7 = vadd.f32 %v643_v34, %v576_v5 }
 0x155   :  { %v645_v14 = vadd.f32 %v644_v7, %v577_v42 }
 0x157   :  { %v646_v56 = vrot.slane %v645_v14, 4 }
 0x159   :  { %v647_v24 = vadd.f32 %v646_v56, %v645_v14 }
 0x15b   :  { %v648_v40 = vrot.slane %v647_v24, 2 }
 0x15d   :  { %v649_v12 = vadd.f32 %v648_v40, %v647_v24 }
 0x15f   :  { %v650_v52 = vrot.slane %v649_v12, 1 }
 0x161   :  { %v651_v17 = vadd.f32 %v650_v52, %v649_v12 }
 0x163   :  { %v675_v28 = vsel %vm674_vm0, %v651_v17, %v614_v61 }
 0x164   :  { %693 = vmatmul.f32.vlgmr.msrb.gmra.mxu1 %v675_v28 }
 0x1e1   :  { %v694_v63 = vpop.f32.mrf.mxu1 }
 0x1e2   :  { %v695_v19 = vadd.f32 %v969_v4, %v694_v63 }
 0x1e4   :  { %v700_v9 = vsel %vm699_vm1, %v695_v19, -1e+30 }
 0x1e5   :  { %v702_v6 = vsel %vm701_vm2, %v700_v9, -inf }
 0x1e6   :  { %703 = vmax.xlane.f32.xlu0 %v702_v6 }
 0x259   :  { %v704_v8 = vpop.xlane.xlu0 %703 }
 0x25a   :  { %v705_v33 = vsub.f32 %v700_v9, %v704_v8 }
 0x25c   :  { %v706_v21 = vmul.f32 1.442695, %v705_v33 }
 0x25e   :  { %970 = vpow2.f32 %v706_v21 }
 0x264   :  { %v971_v18 = vpop.eup %970 }
 0x265   :  { %v708_v25 = vsel %vm701_vm2, %v971_v18, 0.0 }
 0x266   :  { %709 = vadd.xlane.f32.xlu0 %v708_v25 }
 0x2d9   :  { %v710_v13 = vpop.xlane.xlu0 %709 }
 0x2da   :  { %972 = vrcp.f32 %v710_v13  ;;  %v722_v20 = vand.u32 2147483648, %v710_v13  ;;  %v720_v53 = vand.u32 2147483647, %v710_v13  ;;  %vm716_vm4 = vweird.f32 %v710_v13 }
 0x2dc   :  { %v723_v37 = vor.u32 1.1754944e-38, %v722_v20  ;;  %vm721_vm6 = vcmp.eq.f32.partialorder %v720_v53, 8.507059e+37 }
 0x2e0   :  { %v973_v29 = vpop.eup %972 }
 0x2e1   :  { %v712_v26 = vmul.f32 %v973_v29, %v710_v13  ;;  %vm717_vm3 = vweird.f32 %v973_v29 }
 0x2e2   :  { %vm718_vm5 = vmor %vm716_vm4, %vm717_vm3 }
 0x2e3   :  { %v713_v30 = vsub.f32 1.0, %v712_v26 }
 0x2e5   :  { %v714_v31 = vmul.f32 %v973_v29, %v713_v30 }
 0x2e7   :  { %v715_v36 = vadd.f32 %v973_v29, %v714_v31 }
 0x2e9   :  { %v719_v38 = vsel %vm718_vm5, %v973_v29, %v715_v36 }
 0x2ea   :  { %v724_v39 = vsel %vm721_vm6, %v723_v37, %v719_v38 }
 0x2eb   :  { %v725_v46 = vmul.f32 %v971_v18, %v724_v39 }
 0x2ed   :  { %726 = vst [vmem:[#allocation2] sm:$0x3] %v725_v46 }
 0x2ee   :  { %737 = dma.vmem_to_hbm [thread:$0]  %s733_s25, 32, %s735_s28, [#allocation3]  }
 0x2ef   :  { %998 = dma.done.wait [#allocation3], 32  }
 0x2f0   :  { %999 = vsyncadd [#allocation3], 4294967264 }
 0x2f1   :  { %742 = vsyncpa [#allocation3], 1 }

</bundles_post_ra>
